<compile_context>
chip_gen: v7x
topology: tpu7x:2x2x1
jax: 0.10.0
libtpu: 0.0.40
codegen_flags: <defaults>
</compile_context>

<pallas_src>
import jax
import jax.numpy as jnp
from jax.experimental import pallas as pl
from jax.experimental.pallas import tpu as pltpu


# ---------------------------------------------------------------------------
# Config (small, TPU-tile-friendly shapes consistent with the module)
# ---------------------------------------------------------------------------
D_MODEL = 64
D_VOCAB = 256
N_CTX = 16
INIT_RANGE = 0.02

BATCH = 2
SEQ = 8


# ---------------------------------------------------------------------------
# Fused Pallas kernel: one-hot gather matmul against W_EU + pos-logit epilogue
# ---------------------------------------------------------------------------
def fused_zero_layer_kernel(tok_ref, weu_ref, poslog_ref, out_ref):
    # tok_ref    : (M, 1)              int32    flattened token ids
    # weu_ref    : (d_vocab, d_vocab)  bf16     precomputed W_E @ W_U
    # poslog_ref : (seq, d_vocab)      f32      precomputed W_pos[:seq] @ W_U + b_U
    # out_ref    : (M, d_vocab)        f32      logits (vocab lane-dense)
    M = tok_ref.shape[0]
    d_vocab = weu_ref.shape[0]
    seq = poslog_ref.shape[0]
    batch = M // seq

    # Exact one-hot selection matmul on the MXU (bf16 0/1 weights are exact,
    # f32 accumulation). Selects rows of W_EU == (W_E @ W_U)[tokens].
    tok = tok_ref[...]                                               # (M, 1)
    vocab_ids = jax.lax.broadcasted_iota(jnp.int32, (M, d_vocab), 1)
    onehot = (vocab_ids == tok).astype(jnp.bfloat16)                 # (M, d_vocab)
    tok_logits = jnp.dot(onehot, weu_ref[...],
                         preferred_element_type=jnp.float32)         # (M, d_vocab) f32

    # Positional contribution, tiled over the batch (f32 VPU add).
    pos_logits = jnp.tile(poslog_ref[...], (batch, 1))               # (M, d_vocab)

    out_ref[...] = tok_logits + pos_logits


def zero_layer_transformer(tokens, W_E, W_pos, W_U, b_U):
    """Forward pass of the zero-layer transformer.

    tokens: (batch, seq) int32
    returns: (batch, seq, d_vocab) float32
    """
    batch, seq = tokens.shape
    d_vocab = W_U.shape[1]
    M = batch * seq

    # Collapse the two dependent matmuls (valid only at small d_vocab):
    #   logits = (W_E[tok] + W_pos) @ W_U + b_U
    #          = (W_E @ W_U)[tok] + (W_pos @ W_U + b_U)
    W_EU = jnp.dot(W_E, W_U, preferred_element_type=jnp.float32,
                   precision=jax.lax.Precision.HIGHEST).astype(jnp.bfloat16)
    pos_logits = (
        jnp.dot(W_pos[:seq], W_U, preferred_element_type=jnp.float32,
                precision=jax.lax.Precision.HIGHEST)
        + b_U[None, :]
    ).astype(jnp.float32)                                            # (seq, d_vocab)

    tok2d = tokens.reshape(M, 1).astype(jnp.int32)                   # (M, 1)

    vmem = pl.BlockSpec(memory_space=pltpu.MemorySpace.VMEM)

    logits_flat = pl.pallas_call(
        fused_zero_layer_kernel,
        out_shape=jax.ShapeDtypeStruct((M, d_vocab), jnp.float32),
        in_specs=[vmem, vmem, vmem],
        out_specs=vmem,
    )(tok2d, W_EU, pos_logits)

    return logits_flat.reshape(batch, seq, d_vocab)


# ---------------------------------------------------------------------------
# Deterministic parameter init (mirrors nn.init.normal_(std=init_range))
# ---------------------------------------------------------------------------
def init_params(key):
    k_e, k_p, k_u = jax.random.split(key, 3)
    W_E = INIT_RANGE * jax.random.normal(k_e, (D_VOCAB, D_MODEL), jnp.float32)
    W_pos = INIT_RANGE * jax.random.normal(k_p, (N_CTX, D_MODEL), jnp.float32)
    W_U = INIT_RANGE * jax.random.normal(k_u, (D_MODEL, D_VOCAB), jnp.float32)
    b_U = jnp.zeros((D_VOCAB,), jnp.float32)
    return W_E, W_pos, W_U, b_U


if __name__ == "__main__":
    key = jax.random.PRNGKey(0)
    k_tok, k_param = jax.random.split(key)

    tokens = jax.random.randint(k_tok, (BATCH, SEQ), 0, D_VOCAB, dtype=jnp.int32)
    W_E, W_pos, W_U, b_U = init_params(k_param)

    logits = zero_layer_transformer(tokens, W_E, W_pos, W_U, b_U)
    logits = jax.block_until_ready(logits)

    # Pure-JAX reference check (full-precision path). Tolerance loosened to
    # cover the bf16 storage of W_EU (logit magnitudes ~3e-3, bf16 rel ~0.4%).
    ref = jnp.einsum("bsd,dv->bsv", W_E[tokens] + W_pos[None, :SEQ], W_U,
                     precision=jax.lax.Precision.HIGHEST) + b_U
    assert logits.shape == (BATCH, SEQ, D_VOCAB)
    assert jnp.allclose(logits, ref, atol=2e-4, rtol=1e-3), (
        float(jnp.max(jnp.abs(logits - ref)))
    )

    print("KERNEL_OK")
</pallas_src>

<mosaic_0001>
module attributes {stable_mosaic.version = 11 : i64} {
  func.func @fused_zero_layer_kernel(%arg0: memref<16x1xi32, #tpu.memory_space<vmem>>, %arg1: memref<256x256xbf16, #tpu.memory_space<vmem>>, %arg2: memref<8x256xf32, #tpu.memory_space<vmem>>, %arg3: memref<16x256xf32, #tpu.memory_space<vmem>>) attributes {dimension_semantics = [], scalar_prefetch = 0 : i64, scratch_operands = 0 : i64, tpu.core_type = #tpu.core_type<tc>} {
    %c0 = arith.constant 0 : index
    %c0_0 = arith.constant 0 : index
    %0 = vector.load %arg0[%c0, %c0_0] : memref<16x1xi32, #tpu.memory_space<vmem>>, vector<16x1xi32>
    %1 = tpu.iota {dimensions = array<i32: 1>} : vector<16x256xi32>
    %2 = vector.broadcast %0 : vector<16x1xi32> to vector<16x256xi32>
    %3 = arith.cmpi eq, %1, %2 : vector<16x256xi32>
    %4 = arith.extui %3 : vector<16x256xi1> to vector<16x256xi32>
    %5 = arith.sitofp %4 : vector<16x256xi32> to vector<16x256xf32>
    %6 = arith.truncf %5 : vector<16x256xf32> to vector<16x256xbf16>
    %c0_1 = arith.constant 0 : index
    %c0_2 = arith.constant 0 : index
    %7 = vector.load %arg1[%c0_1, %c0_2] : memref<256x256xbf16, #tpu.memory_space<vmem>>, vector<256x256xbf16>
    %cst = arith.constant dense<0.000000e+00> : vector<16x256xf32>
    %8 = tpu.matmul %6, %7, %cst {dimension_numbers = #tpu.dot_dimension_numbers<[1], [0], [0], [1], [0, 0, 1, 1], [], []>} : vector<16x256xbf16>, vector<256x256xbf16>, vector<16x256xf32> -> vector<16x256xf32>
    %c0_3 = arith.constant 0 : index
    %c0_4 = arith.constant 0 : index
    %9 = vector.load %arg2[%c0_3, %c0_4] : memref<8x256xf32, #tpu.memory_space<vmem>>, vector<8x256xf32>
    %10 = tpu.concatenate %9, %9 in 0 : vector<8x256xf32>, vector<8x256xf32> -> vector<16x256xf32>
    %11 = arith.addf %8, %10 : vector<16x256xf32>
    %c0_5 = arith.constant 0 : index
    %c0_6 = arith.constant 0 : index
    %12 = vector.load %arg3[%c0_5, %c0_6] : memref<16x256xf32, #tpu.memory_space<vmem>>, vector<16x256xf32>
    tpu.vector_store %arg3[%c0_5, %c0_6], %11 {strides = array<i32>} : memref<16x256xf32, #tpu.memory_space<vmem>>, vector<16x256xf32>,
    return
  }
}

</mosaic_0001>

<bundles_post_ra>
// kernel: tpu_custom_call.1
= control target key start
LH: loop header
LB: loop body
LE: loop exit
PB: predicated region body
PF: predicated region fallthrough
CT: control target
= control target key end

     0   :  { %8 = vsyncpa [#allocation3], 0  ;;  %s521_s0 = inlined_call_operand.vmem [shape: s32[16,1], index: 0, kind: input, shape index: {}]   ;;  %s522_s1 = inlined_call_operand.hbm [shape: bf16[256,256], index: 1, kind: input, shape index: {}]   ;;  %s523_s2 = inlined_call_operand.vmem [shape: f32[8,256], index: 2, kind: input, shape index: {}]   ;;  %s524_s3 = inlined_call_operand.hbm [shape: f32[16,256], index: 3, kind: output, shape index: {}]  }
   0x1   :  { %9 = vsyncpa [#allocation4], 0  ;;  %s457_s12 = smov [#allocation2]   ;;  %s409_s16 = scalar_lea.hbm %s522_s1, 4096 }
   0x2   :  { %s17_s13 = sshll.u32 %s457_s12, 4  ;;  %p410_p0 = scmp.ne.s32.totalorder %s522_s1, %s409_s16  ;;  %s18_s13 = int_to_ptr.vmem [resolvable:$true] %s17_s13 }
   0x3   :  { %p413_p1 = scmp.lt.u32.totalorder %s409_s16, %s522_s1 }
   0x5   :  { %p415_p2 = pnand %p413_p1, %p410_p0 }
   0x7   :  { %418 = shalt.err (!%p415_p2)
}
   0x8   :  { %s419_s21 = scalar_lea.vmem %s18_s13, 4096  ;;  %p424_p4 = scmp.lt.s32.totalorder %s18_s13, %s18_s13 }
   0x9   :  { %p420_p3 = scmp.ne.s32.totalorder %s18_s13, %s419_s21  ;;  %p425_p5 = scmp.lt.s32.totalorder %s419_s21, %s419_s21 }
   0xb   :  { %p426_p6 = por %p425_p5, %p424_p4 }
   0xd   :  { %p427_p7 = pnand %p426_p6, %p420_p3 }
   0xf   :  { %430 = shalt.err (!%p427_p7)
}
  0x10   :  { %s458_s22 = smov 128   ;;  %s459_s23 = smov 8  }
  0x11   :  { %23 = dma.hbm_to_vmem [thread:$0]  %s522_s1, 4096, %s18_s13, [#allocation3], %s458_s22, %s458_s22, %s459_s23  }
  0x12   :  { %453 = dma.done.wait [#allocation3], 4096  }
  0x13   :  { %454 = vsyncadd [#allocation3], 4294963200  ;;  %v460_v0 = vmov 0   ;;  %v29_v1 = vld [vmem:[%s521_s0] sm:$0xff]  ;;  %v30_v2 = vld [vmem:[%s521_s0 + $0x8] sm:$0xff]  ;;  %v31_v35 = vlaneseq  ;;  %s462_s5 = smov [#allocation5]  }
  0x14   :  { %360 = vset.pattern.permute.xlu0 %v460_v0  ;;  %v361_v3 = vld [vmem:[#allocation2 + $0x4] ss:$8 sps:$4 sm:$0xff]   ;;  %v363_v4 = vld [vmem:[#allocation2] ss:$8 sps:$4 sm:$0xff]   ;;  %v364_v5 = vld [vmem:[#allocation2 + $0x14] ss:$8 sps:$4 sm:$0xff]  }
  0x15   :  { %35 = vperm.xlu0 %360, %v29_v1   ;;  %248 = vmatprep.subr.bf16.mxu0 %v361_v3  ;;  %v366_v6 = vld [vmem:[#allocation2 + $0x10] ss:$8 sps:$4 sm:$0xff]   ;;  %v367_v7 = vld [vmem:[#allocation2 + $0x24] ss:$8 sps:$4 sm:$0xff]   ;;  %v369_v8 = vld [vmem:[#allocation2 + $0x20] ss:$8 sps:$4 sm:$0xff]  }
  0x16   :  { %249 = vmatpush1.bf16.msra.mxu0 %v363_v4  ;;  %v370_v9 = vld [vmem:[#allocation2 + $0x34] ss:$8 sps:$4 sm:$0xff]   ;;  %v372_v10 = vld [vmem:[#allocation2 + $0x30] ss:$8 sps:$4 sm:$0xff]   ;;  %v373_v11 = vld [vmem:[#allocation2 + $0x44] ss:$8 sps:$4 sm:$0xff]  }
  0x17   :  { %250 = vmatprep.subr.bf16.mxu0 %v364_v5  ;;  %v375_v12 = vld [vmem:[#allocation2 + $0x40] ss:$8 sps:$4 sm:$0xff]   ;;  %v376_v13 = vld [vmem:[#allocation2 + $0x54] ss:$8 sps:$4 sm:$0xff]   ;;  %v378_v14 = vld [vmem:[#allocation2 + $0x50] ss:$8 sps:$4 sm:$0xff]  }
  0x18   :  { %v379_v15 = vld [vmem:[#allocation2 + $0x64] ss:$8 sps:$4 sm:$0xff]   ;;  %v381_v16 = vld [vmem:[#allocation2 + $0x60] ss:$8 sps:$4 sm:$0xff]   ;;  %v382_v17 = vld [vmem:[#allocation2 + $0x74] ss:$8 sps:$4 sm:$0xff]  }
  0x19   :  { %38 = vperm.xlu0 %360, %v30_v2   ;;  %v384_v18 = vld [vmem:[#allocation2 + $0x70] ss:$8 sps:$4 sm:$0xff]   ;;  %v385_v19 = vld [vmem:[#allocation2 + $0x84] ss:$8 sps:$4 sm:$0xff]   ;;  %v387_v20 = vld [vmem:[#allocation2 + $0x80] ss:$8 sps:$4 sm:$0xff]  }
  0x1a   :  { %251 = vmatpush1.bf16.msra.mxu0 %v366_v6  ;;  %v388_v21 = vld [vmem:[#allocation2 + $0x94] ss:$8 sps:$4 sm:$0xff]   ;;  %v390_v22 = vld [vmem:[#allocation2 + $0x90] ss:$8 sps:$4 sm:$0xff]   ;;  %v391_v23 = vld [vmem:[#allocation2 + $0xa4] ss:$8 sps:$4 sm:$0xff]  }
  0x1b   :  { %252 = vmatprep.subr.bf16.mxu0 %v367_v7  ;;  %v393_v24 = vld [vmem:[#allocation2 + $0xa0] ss:$8 sps:$4 sm:$0xff]   ;;  %v394_v25 = vld [vmem:[#allocation2 + $0xb4] ss:$8 sps:$4 sm:$0xff]   ;;  %v396_v26 = vld [vmem:[#allocation2 + $0xb0] ss:$8 sps:$4 sm:$0xff]  }
  0x1c   :  { %v397_v27 = vld [vmem:[#allocation2 + $0xc4] ss:$8 sps:$4 sm:$0xff]   ;;  %v399_v28 = vld [vmem:[#allocation2 + $0xc0] ss:$8 sps:$4 sm:$0xff]   ;;  %v400_v29 = vld [vmem:[#allocation2 + $0xd4] ss:$8 sps:$4 sm:$0xff]  }
  0x1d   :  { %v402_v30 = vld [vmem:[#allocation2 + $0xd0] ss:$8 sps:$4 sm:$0xff]   ;;  %v403_v31 = vld [vmem:[#allocation2 + $0xe4] ss:$8 sps:$4 sm:$0xff]   ;;  %v405_v32 = vld [vmem:[#allocation2 + $0xe0] ss:$8 sps:$4 sm:$0xff]  }
  0x1e   :  { %253 = vmatpush1.bf16.msra.mxu0 %v369_v8  ;;  %v406_v33 = vld [vmem:[#allocation2 + $0xf4] ss:$8 sps:$4 sm:$0xff]   ;;  %v408_v34 = vld [vmem:[#allocation2 + $0xf0] ss:$8 sps:$4 sm:$0xff]   ;;  %v32_v36 = vand.u32 127, %v31_v35  ;;  %v86_v41 = vld [vmem:[%s523_s2] sm:$0xff] }
  0x1f   :  { %254 = vmatprep.subr.bf16.mxu0 %v370_v9  ;;  %v461_v40 = vmov 1.0|1.0   ;;  %v87_v42 = vld [vmem:[%s523_s2 + $0x8] sm:$0xff]  ;;  %s300_s6 = sshll.u32 %s462_s5, 4  ;;  %s301_s6 = int_to_ptr.vmem [resolvable:$true] %s300_s6 }
  0x20   :  { %v33_v38 = vadd.s32 128, %v32_v36  ;;  %s431_s7 = scalar_lea.vmem %s301_s6, 512  ;;  %p436_p9 = scmp.lt.s32.totalorder %s301_s6, %s301_s6 }
  0x21   :  { %p432_p8 = scmp.ne.s32.totalorder %s301_s6, %s431_s7  ;;  %p437_p10 = scmp.lt.s32.totalorder %s431_s7, %s431_s7 }
  0x22   :  { %255 = vmatpush1.bf16.msra.mxu0 %v372_v10 }
  0x23   :  { %256 = vmatprep.subr.bf16.mxu0 %v373_v11  ;;  %p438_p11 = por %p437_p10, %p436_p9 }
  0x25   :  { %p439_p12 = pnand %p438_p11, %p432_p8 }
  0x26   :  { %257 = vmatpush1.bf16.msra.mxu0 %v375_v12 }
  0x27   :  { %258 = vmatprep.subr.bf16.mxu0 %v376_v13 }
  0x2a   :  { %259 = vmatpush1.bf16.msra.mxu0 %v378_v14 }
  0x2b   :  { %260 = vmatprep.subr.bf16.mxu0 %v379_v15 }
  0x2e   :  { %261 = vmatpush1.bf16.msra.mxu0 %v381_v16 }
  0x2f   :  { %262 = vmatprep.subr.bf16.mxu0 %v382_v17 }
  0x32   :  { %263 = vmatpush1.bf16.msra.mxu0 %v384_v18 }
  0x33   :  { %264 = vmatprep.subr.bf16.mxu0 %v385_v19 }
  0x36   :  { %265 = vmatpush1.bf16.msra.mxu0 %v387_v20 }
  0x37   :  { %266 = vmatprep.subr.bf16.mxu0 %v388_v21 }
  0x3a   :  { %267 = vmatpush1.bf16.msra.mxu0 %v390_v22 }
  0x3b   :  { %268 = vmatprep.subr.bf16.mxu0 %v391_v23 }
  0x3e   :  { %269 = vmatpush1.bf16.msra.mxu0 %v393_v24 }
  0x3f   :  { %270 = vmatprep.subr.bf16.mxu0 %v394_v25 }
  0x42   :  { %271 = vmatpush1.bf16.msra.mxu0 %v396_v26 }
  0x43   :  { %272 = vmatprep.subr.bf16.mxu0 %v397_v27 }
  0x46   :  { %273 = vmatpush1.bf16.msra.mxu0 %v399_v28 }
  0x47   :  { %274 = vmatprep.subr.bf16.mxu0 %v400_v29 }
  0x4a   :  { %275 = vmatpush1.bf16.msra.mxu0 %v402_v30 }
  0x4b   :  { %276 = vmatprep.subr.bf16.mxu0 %v403_v31 }
  0x4e   :  { %277 = vmatpush1.bf16.msra.mxu0 %v405_v32 }
  0x4f   :  { %278 = vmatprep.subr.bf16.mxu0 %v406_v33 }
  0x52   :  { %279 = vmatpush1.bf16.msra.mxu0 %v408_v34 }
  0x94   :  { %v36_v37 = vpop.permute.xlu0 %35 }
  0x95   :  { %vm40_vm0 = vcmp.eq.s32.totalorder %v32_v36, %v36_v37  ;;  %vm41_vm4 = vcmp.eq.s32.totalorder %v33_v38, %v36_v37 }
  0x98   :  { %v39_v39 = vpop.permute.xlu0 %38 }
  0x99   :  { %vm42_vm1 = vcmp.eq.s32.totalorder %v32_v36, %v39_v39  ;;  %vm43_vm2 = vcmp.eq.s32.totalorder %v33_v38, %v39_v39 }
  0x9a   :  { %vm350_vm3 = vmpackc.low %vm42_vm1, %vm40_vm0 }
  0x9b   :  { %vm348_vm5 = vmpackc.low %vm43_vm2, %vm41_vm4 }
  0x9c   :  { %349 = vmatprep.mubr.msk.bf16.mxu0 %vm348_vm5, %v461_v40 }
  0x9d   :  { %351 = vmatmul.mubr.msk.bf16.vlgmr.msra.gmra.mrb[0].mxu0 %vm350_vm3, %v461_v40 }
 0x170   :  { %v282_v43 = vpop.f32.mrb[0].mxu0 }
 0x171   :  { %v283_v44 = vadd.f32 %v282_v43, %v86_v41  ;;  %v284_v45 = vpop.f32.mrb[1].mxu0 }
 0x172   :  { %v285_v46 = vadd.f32 %v284_v45, %v87_v42  ;;  %v286_v47 = vpop.f32.mrb[2].mxu0 }
 0x173   :  { %291 = vst [vmem:[#allocation5] sm:$0xff] %v283_v44  ;;  %v287_v48 = vadd.f32 %v286_v47, %v86_v41  ;;  %v288_v49 = vpop.f32.mrb[3].mxu0 }
 0x174   :  { %292 = vst [vmem:[#allocation5 + $0x8] sm:$0xff] %v285_v46  ;;  %v289_v50 = vadd.f32 %v288_v49, %v87_v42 }
 0x175   :  { %293 = vst [vmem:[#allocation5 + $0x10] sm:$0xff] %v287_v48 }
 0x176   :  { %294 = vst [vmem:[#allocation5 + $0x18] sm:$0xff] %v289_v50 }
 0x177   :  { %442 = shalt.err (!%p439_p12)
}
 0x178   :  { %s443_s9 = scalar_lea.hbm %s524_s3, 512 }
 0x179   :  { %p444_p13 = scmp.ne.s32.totalorder %s524_s3, %s443_s9  ;;  %p447_p0 = scmp.lt.u32.totalorder %s443_s9, %s524_s3 }
 0x17b   :  { %p449_p1 = pnand %p447_p0, %p444_p13 }
 0x17d   :  { %452 = shalt.err (!%p449_p1)
}
 0x17e   :  { %s463_s14 = smov 256   ;;  %s464_s15 = smov 16  }
 0x17f   :  { %306 = dma.vmem_to_hbm [thread:$0]  %s301_s6, 512, %s524_s3, [#allocation4], %s463_s14, %s463_s14, %s464_s15  }
 0x180   :  { %455 = dma.done.wait [#allocation4], 512  }
 0x181   :  { %456 = vsyncadd [#allocation4], 4294966784 }
 0x182   :  { %310 = vsyncpa [#allocation3], 1 }
 0x183   :  { %311 = vsyncpa [#allocation4], 1 }

</bundles_post_ra>
